<compile_context>
chip_gen: v7x
topology: tpu7x:2x2x1
jax: 0.10.0
libtpu: 0.0.40
codegen_flags: <defaults>
</compile_context>

<pallas_src>
import jax
import jax.numpy as jnp
from jax import lax
from jax.experimental import pallas as pl
from jax.experimental.pallas import tpu as pltpu


def _round_up(x, m):
    return (x + m - 1) // m * m


# --------------------------- fused Siamese kernel ---------------------------
def siamese_kernel(gx_ref, whh_ref, whead_ref, wo_ref, bias_ref, out_ref):
    # gx_ref   : (T, BP, 4H) f32  pre-projected gate inputs x_t@W_ih^T + b,
    #                             gate columns ordered [i, f, o, g]; premise in
    #                             rows [0:B], hypothesis in rows [BP/2:BP/2+B].
    # whh_ref  : (H, 4H)  bf16    W_hh^T, same gate column order.
    # whead_ref: (H, 2H)  bf16    [Wp | Wh]: linear_1 on [p, h, p-h] with the
    #                             concat removed algebraically (Wp=A+C, Wh=B-C).
    # wo_ref   : (H, CPAD) bf16   output weight^T, zero-padded to 128 lanes.
    # bias_ref : (2, CPAD) f32    row 0 lanes [0:H] = b1; row 1 = b_out with
    #                             -1e30 in padded class lanes.
    # out_ref  : (BP, CPAD) f32   softmax probabilities (rows [0:B] valid).
    T, BP, _ = gx_ref.shape
    H = whh_ref.shape[0]
    HALF = BP // 2

    whh = whh_ref[...]

    def step(t, carry):
        h, c = carry
        # Recurrent half only: one small K=H MXU call per step.
        gates = gx_ref[t] + jnp.dot(h.astype(whh.dtype), whh,
                                    preferred_element_type=jnp.float32)
        ifo = jax.nn.sigmoid(gates[:, :3 * H])   # [i, f, o] in one wide sigmoid
        g_g = jnp.tanh(gates[:, 3 * H:])
        i_g = ifo[:, 0:H]
        f_g = ifo[:, H:2 * H]
        o_g = ifo[:, 2 * H:3 * H]
        c_new = f_g * c + i_g * g_g
        h_new = o_g * jnp.tanh(c_new)
        return (h_new, c_new)

    h0 = jnp.zeros((BP, H), jnp.float32)
    c0 = jnp.zeros((BP, H), jnp.float32)
    # T is a small static constant: fully unroll so MXU pushes of step t+1
    # overlap the VPU/EUP gate math of step t.
    hN, _ = lax.fori_loop(0, T, step, (h0, c0), unroll=True)

    # Head: ONE fused matmul over the full BP rows (dense MXU M-dim).
    r = jnp.dot(hN.astype(whead_ref.dtype), whead_ref[...],
                preferred_element_type=jnp.float32)             # (BP, 2H)
    # Bring the hypothesis half-block of rows on top of the premise rows
    # (explicit sublane shift; direction is unambiguous by construction).
    hyp = jnp.concatenate([r[HALF:, H:2 * H], r[:HALF, H:2 * H]], axis=0)
    bias = bias_ref[...]
    fusion = jnp.maximum(r[:, 0:H] + hyp + bias[0:1, 0:H], 0.0)  # (BP, H)
    # TODO(synk): F.dropout(p=args.dropout) is stochastic (training-mode by
    # default in the reference); identity here (inference semantics).

    logits = (jnp.dot(fusion.astype(wo_ref.dtype), wo_ref[...],
                      preferred_element_type=jnp.float32) + bias[1:2, :])
    m = jnp.max(logits, axis=1, keepdims=True)
    e = jnp.exp(logits - m)                  # pad lanes: exp(-1e30 - m) -> 0
    out_ref[...] = e / jnp.sum(e, axis=1, keepdims=True)


# ------------------- one-time parameter packing (load time) ------------------
def pack_params(params, *, matmul_dtype=jnp.bfloat16):
    H = params["w_hh"].shape[1]
    C = params["w_out"].shape[0]
    CPAD = _round_up(max(C, 128), 128)       # lane-dense output / softmax

    # PyTorch nn.LSTM gate order along 4H is [i, f, g, o]; permute to
    # [i, f, o, g] so the kernel applies one contiguous wide sigmoid.
    idx = jnp.concatenate([jnp.arange(0, 2 * H),
                           jnp.arange(3 * H, 4 * H),
                           jnp.arange(2 * H, 3 * H)])
    w_ih = params["w_ih"][idx]                                    # (4H, E)
    w_hh = params["w_hh"][idx]                                    # (4H, H)
    b = (params["b_ih"] + params["b_hh"])[idx]                    # (4H,)

    # Fold embedding lookup + input projection + bias into ONE table:
    # gproj[v] = embed[v] @ W_ih^T + (b_ih + b_hh)   -> (VOCAB, 4H), f32.
    gproj = (params["embed"].astype(jnp.float32) @ w_ih.T.astype(jnp.float32)
             + b[None, :].astype(jnp.float32))

    whh_t = w_hh.T.astype(matmul_dtype)                           # (H, 4H)

    # linear_1 on [p, h, p-h]  ==  p @ (A + C) + h @ (B - C) + b1,
    # where W1^T = [A; B; C] in (H, H) blocks — removes the lane-axis concat.
    w1t = params["w1"].T                                          # (3H, H)
    wp = w1t[0:H] + w1t[2 * H:3 * H]
    wh = w1t[H:2 * H] - w1t[2 * H:3 * H]
    w_head = jnp.concatenate([wp, wh], axis=1).astype(matmul_dtype)  # (H, 2H)

    wo = jnp.pad(params["w_out"].T,
                 ((0, 0), (0, CPAD - C))).astype(matmul_dtype)    # (H, CPAD)

    # Pack the two bias vectors into one f32 slab (keep f32: -1e30 pad lanes
    # must not be cast to bf16).
    bias_slab = jnp.zeros((2, CPAD), jnp.float32)
    bias_slab = bias_slab.at[0, :H].set(params["b1"].astype(jnp.float32))
    bias_slab = bias_slab.at[1, :].set(-1e30)
    bias_slab = bias_slab.at[1, :C].set(params["b_out"].astype(jnp.float32))

    return {"gproj": gproj, "whh_t": whh_t, "w_head": w_head,
            "wo": wo, "bias": bias_slab, "H": H, "C": C, "CPAD": CPAD}


# ------------------------------ per-call wrapper -----------------------------
def siamese_forward(packed, p_ids, h_ids):
    B, T = p_ids.shape
    C, CPAD = packed["C"], packed["CPAD"]
    BP = _round_up(2 * B, 8)                 # fill f32 sublanes
    HALF = BP // 2

    # Row layout (time-major): premise in rows [0:B], hypothesis in rows
    # [HALF:HALF+B], remaining rows are padding (index 0 -> harmless, finite).
    ids = jnp.zeros((T, BP), jnp.int32)
    ids = ids.at[:, 0:B].set(p_ids.T)
    ids = ids.at[:, HALF:HALF + B].set(h_ids.T)

    # Single gather into the pre-projected table -> lane-dense (T, BP, 4H) f32.
    gx = jnp.take(packed["gproj"], ids, axis=0)

    vmem = pl.BlockSpec(memory_space=pltpu.MemorySpace.VMEM)
    probs_padded = pl.pallas_call(
        siamese_kernel,
        out_shape=jax.ShapeDtypeStruct((BP, CPAD), jnp.float32),
        in_specs=[vmem] * 5,
        out_specs=vmem,
    )(gx, packed["whh_t"], packed["w_head"], packed["wo"], packed["bias"])

    return probs_padded[:B, :C]   # softmax probabilities, matching F.softmax


# ------------------------- pure-JAX reference (f32) --------------------------
def reference_forward(params, p_ids, h_ids):
    H = params["w_hh"].shape[1]

    def lstm_last(ids):
        x = params["embed"][ids]                          # (B, T, E)
        Bn, Tn = ids.shape
        h = jnp.zeros((Bn, H), jnp.float32)
        c = jnp.zeros((Bn, H), jnp.float32)
        for t in range(Tn):
            gates = (x[:, t] @ params["w_ih"].T + params["b_ih"]
                     + h @ params["w_hh"].T + params["b_hh"])
            i, f, g, o = jnp.split(gates, 4, axis=1)      # PyTorch order
            i = jax.nn.sigmoid(i); f = jax.nn.sigmoid(f)
            g = jnp.tanh(g);       o = jax.nn.sigmoid(o)
            c = f * c + i * g
            h = o * jnp.tanh(c)
        return h

    p = lstm_last(p_ids)
    h = lstm_last(h_ids)
    ph = jnp.concatenate([p, h, p - h], axis=1)
    fusion = jax.nn.relu(ph @ params["w1"].T + params["b1"])
    logits = fusion @ params["w_out"].T + params["b_out"]
    return jax.nn.softmax(logits, axis=1)


# --------------------------------- main --------------------------------------
if __name__ == "__main__":
    # Small, deterministic configuration.
    VOCAB, E, H, C = 20, 32, 32, 4   # vocab, embed_dim, hidden_size, class_size
    B, T = 2, 8                      # batch, sequence length

    key = jax.random.PRNGKey(0)
    ks = jax.random.split(key, 11)

    params = {
        "embed": jax.random.normal(ks[0], (VOCAB, E), jnp.float32) * 0.1,
        "w_ih": jax.random.normal(ks[1], (4 * H, E), jnp.float32) * 0.1,
        "w_hh": jax.random.normal(ks[2], (4 * H, H), jnp.float32) * 0.1,
        "b_ih": jax.random.normal(ks[3], (4 * H,), jnp.float32) * 0.1,
        "b_hh": jax.random.normal(ks[4], (4 * H,), jnp.float32) * 0.1,
        "w1": jax.random.normal(ks[5], (H, 3 * H), jnp.float32) * 0.1,
        "b1": jax.random.normal(ks[6], (H,), jnp.float32) * 0.1,
        "w_out": jax.random.normal(ks[7], (C, H), jnp.float32) * 0.1,
        "b_out": jax.random.normal(ks[8], (C,), jnp.float32) * 0.1,
    }

    p_ids = jax.random.randint(ks[9], (B, T), 0, VOCAB, dtype=jnp.int32)
    h_ids = jax.random.randint(ks[10], (B, T), 0, VOCAB, dtype=jnp.int32)

    packed = pack_params(params)                 # one-time, load-time cost
    probs = siamese_forward(packed, p_ids, h_ids)
    jax.block_until_ready(probs)

    assert probs.shape == (B, C)
    assert bool(jnp.all(jnp.isfinite(probs)))

    ref = reference_forward(params, p_ids, h_ids)
    assert bool(jnp.max(jnp.abs(probs - ref)) < 2e-2)   # bf16 MXU tolerance

    print("KERNEL_OK")
</pallas_src>

<mosaic_0001>
module attributes {stable_mosaic.version = 11 : i64} {
  func.func @siamese_kernel(%arg0: memref<8x8x128xf32, #tpu.memory_space<vmem>>, %arg1: memref<32x128xbf16, #tpu.memory_space<vmem>>, %arg2: memref<32x64xbf16, #tpu.memory_space<vmem>>, %arg3: memref<32x128xbf16, #tpu.memory_space<vmem>>, %arg4: memref<2x128xf32, #tpu.memory_space<vmem>>, %arg5: memref<8x128xf32, #tpu.memory_space<vmem>>) attributes {dimension_semantics = [], scalar_prefetch = 0 : i64, scratch_operands = 0 : i64, tpu.core_type = #tpu.core_type<tc>} {
    %c0 = arith.constant 0 : index
    %c0_0 = arith.constant 0 : index
    %0 = vector.load %arg1[%c0, %c0_0] : memref<32x128xbf16, #tpu.memory_space<vmem>>, vector<32x128xbf16>
    %cst = arith.constant 0.000000e+00 : f32
    %1 = vector.broadcast %cst : f32 to vector<8x32xf32>
    %cst_1 = arith.constant 0.000000e+00 : f32
    %2 = vector.broadcast %cst_1 : f32 to vector<8x32xf32>
    %c0_i32 = arith.constant 0 : i32
    %3 = arith.index_cast %c0_i32 : i32 to index
    %c0_2 = arith.constant 0 : index
    %c0_3 = arith.constant 0 : index
    %4 = vector.load %arg0[%3, %c0_2, %c0_3] : memref<8x8x128xf32, #tpu.memory_space<vmem>>, vector<1x8x128xf32>
    %5 = vector.shape_cast %4 : vector<1x8x128xf32> to vector<8x128xf32>
    %6 = arith.truncf %1 : vector<8x32xf32> to vector<8x32xbf16>
    %cst_4 = arith.constant dense<0.000000e+00> : vector<8x128xf32>
    %7 = tpu.matmul %6, %0, %cst_4 {dimension_numbers = #tpu.dot_dimension_numbers<[1], [0], [0], [1], [0, 0, 1, 1], [], []>} : vector<8x32xbf16>, vector<32x128xbf16>, vector<8x128xf32> -> vector<8x128xf32>
    %8 = arith.addf %5, %7 : vector<8x128xf32>
    %9 = vector.extract_strided_slice %8 {offsets = [0, 0], sizes = [8, 96], strides = [1, 1]} : vector<8x128xf32> to vector<8x96xf32>
    %10 = arith.negf %9 : vector<8x96xf32>
    %11 = math.exp %10 : vector<8x96xf32>
    %cst_5 = arith.constant 1.000000e+00 : f32
    %12 = vector.broadcast %cst_5 : f32 to vector<8x96xf32>
    %13 = arith.addf %12, %11 : vector<8x96xf32>
    %14 = arith.divf %12, %13 : vector<8x96xf32>
    %15 = vector.extract_strided_slice %8 {offsets = [0, 96], sizes = [8, 32], strides = [1, 1]} : vector<8x128xf32> to vector<8x32xf32>
    %16 = math.tanh %15 : vector<8x32xf32>
    %17 = vector.extract_strided_slice %14 {offsets = [0, 0], sizes = [8, 32], strides = [1, 1]} : vector<8x96xf32> to vector<8x32xf32>
    %18 = vector.extract_strided_slice %14 {offsets = [0, 32], sizes = [8, 32], strides = [1, 1]} : vector<8x96xf32> to vector<8x32xf32>
    %19 = vector.extract_strided_slice %14 {offsets = [0, 64], sizes = [8, 32], strides = [1, 1]} : vector<8x96xf32> to vector<8x32xf32>
    %20 = arith.mulf %18, %2 : vector<8x32xf32>
    %21 = arith.mulf %17, %16 : vector<8x32xf32>
    %22 = arith.addf %20, %21 : vector<8x32xf32>
    %23 = math.tanh %22 : vector<8x32xf32>
    %24 = arith.mulf %19, %23 : vector<8x32xf32>
    %c1_i32 = arith.constant 1 : i32
    %25 = arith.index_cast %c1_i32 : i32 to index
    %c0_6 = arith.constant 0 : index
    %c0_7 = arith.constant 0 : index
    %26 = vector.load %arg0[%25, %c0_6, %c0_7] : memref<8x8x128xf32, #tpu.memory_space<vmem>>, vector<1x8x128xf32>
    %27 = vector.shape_cast %26 : vector<1x8x128xf32> to vector<8x128xf32>
    %28 = arith.truncf %24 : vector<8x32xf32> to vector<8x32xbf16>
    %cst_8 = arith.constant dense<0.000000e+00> : vector<8x128xf32>
    %29 = tpu.matmul %28, %0, %cst_8 {dimension_numbers = #tpu.dot_dimension_numbers<[1], [0], [0], [1], [0, 0, 1, 1], [], []>} : vector<8x32xbf16>, vector<32x128xbf16>, vector<8x128xf32> -> vector<8x128xf32>
    %30 = arith.addf %27, %29 : vector<8x128xf32>
    %31 = vector.extract_strided_slice %30 {offsets = [0, 0], sizes = [8, 96], strides = [1, 1]} : vector<8x128xf32> to vector<8x96xf32>
    %32 = arith.negf %31 : vector<8x96xf32>
    %33 = math.exp %32 : vector<8x96xf32>
    %cst_9 = arith.constant 1.000000e+00 : f32
    %34 = vector.broadcast %cst_9 : f32 to vector<8x96xf32>
    %35 = arith.addf %34, %33 : vector<8x96xf32>
    %36 = arith.divf %34, %35 : vector<8x96xf32>
    %37 = vector.extract_strided_slice %30 {offsets = [0, 96], sizes = [8, 32], strides = [1, 1]} : vector<8x128xf32> to vector<8x32xf32>
    %38 = math.tanh %37 : vector<8x32xf32>
    %39 = vector.extract_strided_slice %36 {offsets = [0, 0], sizes = [8, 32], strides = [1, 1]} : vector<8x96xf32> to vector<8x32xf32>
    %40 = vector.extract_strided_slice %36 {offsets = [0, 32], sizes = [8, 32], strides = [1, 1]} : vector<8x96xf32> to vector<8x32xf32>
    %41 = vector.extract_strided_slice %36 {offsets = [0, 64], sizes = [8, 32], strides = [1, 1]} : vector<8x96xf32> to vector<8x32xf32>
    %42 = arith.mulf %40, %22 : vector<8x32xf32>
    %43 = arith.mulf %39, %38 : vector<8x32xf32>
    %44 = arith.addf %42, %43 : vector<8x32xf32>
    %45 = math.tanh %44 : vector<8x32xf32>
    %46 = arith.mulf %41, %45 : vector<8x32xf32>
    %c2_i32 = arith.constant 2 : i32
    %47 = arith.index_cast %c2_i32 : i32 to index
    %c0_10 = arith.constant 0 : index
    %c0_11 = arith.constant 0 : index
    %48 = vector.load %arg0[%47, %c0_10, %c0_11] : memref<8x8x128xf32, #tpu.memory_space<vmem>>, vector<1x8x128xf32>
    %49 = vector.shape_cast %48 : vector<1x8x128xf32> to vector<8x128xf32>
    %50 = arith.truncf %46 : vector<8x32xf32> to vector<8x32xbf16>
    %cst_12 = arith.constant dense<0.000000e+00> : vector<8x128xf32>
    %51 = tpu.matmul %50, %0, %cst_12 {dimension_numbers = #tpu.dot_dimension_numbers<[1], [0], [0], [1], [0, 0, 1, 1], [], []>} : vector<8x32xbf16>, vector<32x128xbf16>, vector<8x128xf32> -> vector<8x128xf32>
    %52 = arith.addf %49, %51 : vector<8x128xf32>
    %53 = vector.extract_strided_slice %52 {offsets = [0, 0], sizes = [8, 96], strides = [1, 1]} : vector<8x128xf32> to vector<8x96xf32>
    %54 = arith.negf %53 : vector<8x96xf32>
    %55 = math.exp %54 : vector<8x96xf32>
    %cst_13 = arith.constant 1.000000e+00 : f32
    %56 = vector.broadcast %cst_13 : f32 to vector<8x96xf32>
    %57 = arith.addf %56, %55 : vector<8x96xf32>
    %58 = arith.divf %56, %57 : vector<8x96xf32>
    %59 = vector.extract_strided_slice %52 {offsets = [0, 96], sizes = [8, 32], strides = [1, 1]} : vector<8x128xf32> to vector<8x32xf32>
    %60 = math.tanh %59 : vector<8x32xf32>
    %61 = vector.extract_strided_slice %58 {offsets = [0, 0], sizes = [8, 32], strides = [1, 1]} : vector<8x96xf32> to vector<8x32xf32>
    %62 = vector.extract_strided_slice %58 {offsets = [0, 32], sizes = [8, 32], strides = [1, 1]} : vector<8x96xf32> to vector<8x32xf32>
    %63 = vector.extract_strided_slice %58 {offsets = [0, 64], sizes = [8, 32], strides = [1, 1]} : vector<8x96xf32> to vector<8x32xf32>
    %64 = arith.mulf %62, %44 : vector<8x32xf32>
    %65 = arith.mulf %61, %60 : vector<8x32xf32>
    %66 = arith.addf %64, %65 : vector<8x32xf32>
    %67 = math.tanh %66 : vector<8x32xf32>
    %68 = arith.mulf %63, %67 : vector<8x32xf32>
    %c3_i32 = arith.constant 3 : i32
    %69 = arith.index_cast %c3_i32 : i32 to index
    %c0_14 = arith.constant 0 : index
    %c0_15 = arith.constant 0 : index
    %70 = vector.load %arg0[%69, %c0_14, %c0_15] : memref<8x8x128xf32, #tpu.memory_space<vmem>>, vector<1x8x128xf32>
    %71 = vector.shape_cast %70 : vector<1x8x128xf32> to vector<8x128xf32>
    %72 = arith.truncf %68 : vector<8x32xf32> to vector<8x32xbf16>
    %cst_16 = arith.constant dense<0.000000e+00> : vector<8x128xf32>
    %73 = tpu.matmul %72, %0, %cst_16 {dimension_numbers = #tpu.dot_dimension_numbers<[1], [0], [0], [1], [0, 0, 1, 1], [], []>} : vector<8x32xbf16>, vector<32x128xbf16>, vector<8x128xf32> -> vector<8x128xf32>
    %74 = arith.addf %71, %73 : vector<8x128xf32>
    %75 = vector.extract_strided_slice %74 {offsets = [0, 0], sizes = [8, 96], strides = [1, 1]} : vector<8x128xf32> to vector<8x96xf32>
    %76 = arith.negf %75 : vector<8x96xf32>
    %77 = math.exp %76 : vector<8x96xf32>
    %cst_17 = arith.constant 1.000000e+00 : f32
    %78 = vector.broadcast %cst_17 : f32 to vector<8x96xf32>
    %79 = arith.addf %78, %77 : vector<8x96xf32>
    %80 = arith.divf %78, %79 : vector<8x96xf32>
    %81 = vector.extract_strided_slice %74 {offsets = [0, 96], sizes = [8, 32], strides = [1, 1]} : vector<8x128xf32> to vector<8x32xf32>
    %82 = math.tanh %81 : vector<8x32xf32>
    %83 = vector.extract_strided_slice %80 {offsets = [0, 0], sizes = [8, 32], strides = [1, 1]} : vector<8x96xf32> to vector<8x32xf32>
    %84 = vector.extract_strided_slice %80 {offsets = [0, 32], sizes = [8, 32], strides = [1, 1]} : vector<8x96xf32> to vector<8x32xf32>
    %85 = vector.extract_strided_slice %80 {offsets = [0, 64], sizes = [8, 32], strides = [1, 1]} : vector<8x96xf32> to vector<8x32xf32>
    %86 = arith.mulf %84, %66 : vector<8x32xf32>
    %87 = arith.mulf %83, %82 : vector<8x32xf32>
    %88 = arith.addf %86, %87 : vector<8x32xf32>
    %89 = math.tanh %88 : vector<8x32xf32>
    %90 = arith.mulf %85, %89 : vector<8x32xf32>
    %c4_i32 = arith.constant 4 : i32
    %91 = arith.index_cast %c4_i32 : i32 to index
    %c0_18 = arith.constant 0 : index
    %c0_19 = arith.constant 0 : index
    %92 = vector.load %arg0[%91, %c0_18, %c0_19] : memref<8x8x128xf32, #tpu.memory_space<vmem>>, vector<1x8x128xf32>
    %93 = vector.shape_cast %92 : vector<1x8x128xf32> to vector<8x128xf32>
    %94 = arith.truncf %90 : vector<8x32xf32> to vector<8x32xbf16>
    %cst_20 = arith.constant dense<0.000000e+00> : vector<8x128xf32>
    %95 = tpu.matmul %94, %0, %cst_20 {dimension_numbers = #tpu.dot_dimension_numbers<[1], [0], [0], [1], [0, 0, 1, 1], [], []>} : vector<8x32xbf16>, vector<32x128xbf16>, vector<8x128xf32> -> vector<8x128xf32>
    %96 = arith.addf %93, %95 : vector<8x128xf32>
    %97 = vector.extract_strided_slice %96 {offsets = [0, 0], sizes = [8, 96], strides = [1, 1]} : vector<8x128xf32> to vector<8x96xf32>
    %98 = arith.negf %97 : vector<8x96xf32>
    %99 = math.exp %98 : vector<8x96xf32>
    %cst_21 = arith.constant 1.000000e+00 : f32
    %100 = vector.broadcast %cst_21 : f32 to vector<8x96xf32>
    %101 = arith.addf %100, %99 : vector<8x96xf32>
    %102 = arith.divf %100, %101 : vector<8x96xf32>
    %103 = vector.extract_strided_slice %96 {offsets = [0, 96], sizes = [8, 32], strides = [1, 1]} : vector<8x128xf32> to vector<8x32xf32>
    %104 = math.tanh %103 : vector<8x32xf32>
    %105 = vector.extract_strided_slice %102 {offsets = [0, 0], sizes = [8, 32], strides = [1, 1]} : vector<8x96xf32> to vector<8x32xf32>
    %106 = vector.extract_strided_slice %102 {offsets = [0, 32], sizes = [8, 32], strides = [1, 1]} : vector<8x96xf32> to vector<8x32xf32>
    %107 = vector.extract_strided_slice %102 {offsets = [0, 64], sizes = [8, 32], strides = [1, 1]} : vector<8x96xf32> to vector<8x32xf32>
    %108 = arith.mulf %106, %88 : vector<8x32xf32>
    %109 = arith.mulf %105, %104 : vector<8x32xf32>
    %110 = arith.addf %108, %109 : vector<8x32xf32>
    %111 = math.tanh %110 : vector<8x32xf32>
    %112 = arith.mulf %107, %111 : vector<8x32xf32>
    %c5_i32 = arith.constant 5 : i32
    %113 = arith.index_cast %c5_i32 : i32 to index
    %c0_22 = arith.constant 0 : index
    %c0_23 = arith.constant 0 : index
    %114 = vector.load %arg0[%113, %c0_22, %c0_23] : memref<8x8x128xf32, #tpu.memory_space<vmem>>, vector<1x8x128xf32>
    %115 = vector.shape_cast %114 : vector<1x8x128xf32> to vector<8x128xf32>
    %116 = arith.truncf %112 : vector<8x32xf32> to vector<8x32xbf16>
    %cst_24 = arith.constant dense<0.000000e+00> : vector<8x128xf32>
    %117 = tpu.matmul %116, %0, %cst_24 {dimension_numbers = #tpu.dot_dimension_numbers<[1], [0], [0], [1], [0, 0, 1, 1], [], []>} : vector<8x32xbf16>, vector<32x128xbf16>, vector<8x128xf32> -> vector<8x128xf32>
    %118 = arith.addf %115, %117 : vector<8x128xf32>
    %119 = vector.extract_strided_slice %118 {offsets = [0, 0], sizes = [8, 96], strides = [1, 1]} : vector<8x128xf32> to vector<8x96xf32>
    %120 = arith.negf %119 : vector<8x96xf32>
    %121 = math.exp %120 : vector<8x96xf32>
    %cst_25 = arith.constant 1.000000e+00 : f32
    %122 = vector.broadcast %cst_25 : f32 to vector<8x96xf32>
    %123 = arith.addf %122, %121 : vector<8x96xf32>
    %124 = arith.divf %122, %123 : vector<8x96xf32>
    %125 = vector.extract_strided_slice %118 {offsets = [0, 96], sizes = [8, 32], strides = [1, 1]} : vector<8x128xf32> to vector<8x32xf32>
    %126 = math.tanh %125 : vector<8x32xf32>
    %127 = vector.extract_strided_slice %124 {offsets = [0, 0], sizes = [8, 32], strides = [1, 1]} : vector<8x96xf32> to vector<8x32xf32>
    %128 = vector.extract_strided_slice %124 {offsets = [0, 32], sizes = [8, 32], strides = [1, 1]} : vector<8x96xf32> to vector<8x32xf32>
    %129 = vector.extract_strided_slice %124 {offsets = [0, 64], sizes = [8, 32], strides = [1, 1]} : vector<8x96xf32> to vector<8x32xf32>
    %130 = arith.mulf %128, %110 : vector<8x32xf32>
    %131 = arith.mulf %127, %126 : vector<8x32xf32>
    %132 = arith.addf %130, %131 : vector<8x32xf32>
    %133 = math.tanh %132 : vector<8x32xf32>
    %134 = arith.mulf %129, %133 : vector<8x32xf32>
    %c6_i32 = arith.constant 6 : i32
    %135 = arith.index_cast %c6_i32 : i32 to index
    %c0_26 = arith.constant 0 : index
    %c0_27 = arith.constant 0 : index
    %136 = vector.load %arg0[%135, %c0_26, %c0_27] : memref<8x8x128xf32, #tpu.memory_space<vmem>>, vector<1x8x128xf32>
    %137 = vector.shape_cast %136 : vector<1x8x128xf32> to vector<8x128xf32>
    %138 = arith.truncf %134 : vector<8x32xf32> to vector<8x32xbf16>
    %cst_28 = arith.constant dense<0.000000e+00> : vector<8x128xf32>
    %139 = tpu.matmul %138, %0, %cst_28 {dimension_numbers = #tpu.dot_dimension_numbers<[1], [0], [0], [1], [0, 0, 1, 1], [], []>} : vector<8x32xbf16>, vector<32x128xbf16>, vector<8x128xf32> -> vector<8x128xf32>
    %140 = arith.addf %137, %139 : vector<8x128xf32>
    %141 = vector.extract_strided_slice %140 {offsets = [0, 0], sizes = [8, 96], strides = [1, 1]} : vector<8x128xf32> to vector<8x96xf32>
    %142 = arith.negf %141 : vector<8x96xf32>
    %143 = math.exp %142 : vector<8x96xf32>
    %cst_29 = arith.constant 1.000000e+00 : f32
    %144 = vector.broadcast %cst_29 : f32 to vector<8x96xf32>
    %145 = arith.addf %144, %143 : vector<8x96xf32>
    %146 = arith.divf %144, %145 : vector<8x96xf32>
    %147 = vector.extract_strided_slice %140 {offsets = [0, 96], sizes = [8, 32], strides = [1, 1]} : vector<8x128xf32> to vector<8x32xf32>
    %148 = math.tanh %147 : vector<8x32xf32>
    %149 = vector.extract_strided_slice %146 {offsets = [0, 0], sizes = [8, 32], strides = [1, 1]} : vector<8x96xf32> to vector<8x32xf32>
    %150 = vector.extract_strided_slice %146 {offsets = [0, 32], sizes = [8, 32], strides = [1, 1]} : vector<8x96xf32> to vector<8x32xf32>
    %151 = vector.extract_strided_slice %146 {offsets = [0, 64], sizes = [8, 32], strides = [1, 1]} : vector<8x96xf32> to vector<8x32xf32>
    %152 = arith.mulf %150, %132 : vector<8x32xf32>
    %153 = arith.mulf %149, %148 : vector<8x32xf32>
    %154 = arith.addf %152, %153 : vector<8x32xf32>
    %155 = math.tanh %154 : vector<8x32xf32>
    %156 = arith.mulf %151, %155 : vector<8x32xf32>
    %c7_i32 = arith.constant 7 : i32
    %157 = arith.index_cast %c7_i32 : i32 to index
    %c0_30 = arith.constant 0 : index
    %c0_31 = arith.constant 0 : index
    %158 = vector.load %arg0[%157, %c0_30, %c0_31] : memref<8x8x128xf32, #tpu.memory_space<vmem>>, vector<1x8x128xf32>
    %159 = vector.shape_cast %158 : vector<1x8x128xf32> to vector<8x128xf32>
    %160 = arith.truncf %156 : vector<8x32xf32> to vector<8x32xbf16>
    %cst_32 = arith.constant dense<0.000000e+00> : vector<8x128xf32>
    %161 = tpu.matmul %160, %0, %cst_32 {dimension_numbers = #tpu.dot_dimension_numbers<[1], [0], [0], [1], [0, 0, 1, 1], [], []>} : vector<8x32xbf16>, vector<32x128xbf16>, vector<8x128xf32> -> vector<8x128xf32>
    %162 = arith.addf %159, %161 : vector<8x128xf32>
    %163 = vector.extract_strided_slice %162 {offsets = [0, 0], sizes = [8, 96], strides = [1, 1]} : vector<8x128xf32> to vector<8x96xf32>
    %164 = arith.negf %163 : vector<8x96xf32>
    %165 = math.exp %164 : vector<8x96xf32>
    %cst_33 = arith.constant 1.000000e+00 : f32
    %166 = vector.broadcast %cst_33 : f32 to vector<8x96xf32>
    %167 = arith.addf %166, %165 : vector<8x96xf32>
    %168 = arith.divf %166, %167 : vector<8x96xf32>
    %169 = vector.extract_strided_slice %162 {offsets = [0, 96], sizes = [8, 32], strides = [1, 1]} : vector<8x128xf32> to vector<8x32xf32>
    %170 = math.tanh %169 : vector<8x32xf32>
    %171 = vector.extract_strided_slice %168 {offsets = [0, 0], sizes = [8, 32], strides = [1, 1]} : vector<8x96xf32> to vector<8x32xf32>
    %172 = vector.extract_strided_slice %168 {offsets = [0, 32], sizes = [8, 32], strides = [1, 1]} : vector<8x96xf32> to vector<8x32xf32>
    %173 = vector.extract_strided_slice %168 {offsets = [0, 64], sizes = [8, 32], strides = [1, 1]} : vector<8x96xf32> to vector<8x32xf32>
    %174 = arith.mulf %172, %154 : vector<8x32xf32>
    %175 = arith.mulf %171, %170 : vector<8x32xf32>
    %176 = arith.addf %174, %175 : vector<8x32xf32>
    %177 = math.tanh %176 : vector<8x32xf32>
    %178 = arith.mulf %173, %177 : vector<8x32xf32>
    %c8_i32 = arith.constant 8 : i32
    %179 = arith.truncf %178 : vector<8x32xf32> to vector<8x32xbf16>
    %c0_34 = arith.constant 0 : index
    %c0_35 = arith.constant 0 : index
    %180 = vector.load %arg2[%c0_34, %c0_35] : memref<32x64xbf16, #tpu.memory_space<vmem>>, vector<32x64xbf16>
    %cst_36 = arith.constant dense<0.000000e+00> : vector<8x64xf32>
    %181 = tpu.matmul %179, %180, %cst_36 {dimension_numbers = #tpu.dot_dimension_numbers<[1], [0], [0], [1], [0, 0, 1, 1], [], []>} : vector<8x32xbf16>, vector<32x64xbf16>, vector<8x64xf32> -> vector<8x64xf32>
    %182 = vector.extract_strided_slice %181 {offsets = [4, 32], sizes = [4, 32], strides = [1, 1]} : vector<8x64xf32> to vector<4x32xf32>
    %183 = vector.extract_strided_slice %181 {offsets = [0, 32], sizes = [4, 32], strides = [1, 1]} : vector<8x64xf32> to vector<4x32xf32>
    %184 = tpu.concatenate %182, %183 in 0 : vector<4x32xf32>, vector<4x32xf32> -> vector<8x32xf32>
    %c0_37 = arith.constant 0 : index
    %c0_38 = arith.constant 0 : index
    %185 = vector.load %arg4[%c0_37, %c0_38] : memref<2x128xf32, #tpu.memory_space<vmem>>, vector<2x128xf32>
    %186 = vector.extract_strided_slice %181 {offsets = [0, 0], sizes = [8, 32], strides = [1, 1]} : vector<8x64xf32> to vector<8x32xf32>
    %187 = arith.addf %186, %184 : vector<8x32xf32>
    %188 = vector.extract_strided_slice %185 {offsets = [0, 0], sizes = [1, 32], strides = [1, 1]} : vector<2x128xf32> to vector<1x32xf32>
    %189 = vector.broadcast %188 : vector<1x32xf32> to vector<8x32xf32>
    %190 = arith.addf %187, %189 : vector<8x32xf32>
    %cst_39 = arith.constant 0.000000e+00 : f32
    %191 = vector.broadcast %cst_39 : f32 to vector<8x32xf32>
    %192 = arith.maximumf %190, %191 : vector<8x32xf32>
    %193 = arith.truncf %192 : vector<8x32xf32> to vector<8x32xbf16>
    %c0_40 = arith.constant 0 : index
    %c0_41 = arith.constant 0 : index
    %194 = vector.load %arg3[%c0_40, %c0_41] : memref<32x128xbf16, #tpu.memory_space<vmem>>, vector<32x128xbf16>
    %cst_42 = arith.constant dense<0.000000e+00> : vector<8x128xf32>
    %195 = tpu.matmul %193, %194, %cst_42 {dimension_numbers = #tpu.dot_dimension_numbers<[1], [0], [0], [1], [0, 0, 1, 1], [], []>} : vector<8x32xbf16>, vector<32x128xbf16>, vector<8x128xf32> -> vector<8x128xf32>
    %196 = vector.extract_strided_slice %185 {offsets = [1, 0], sizes = [1, 128], strides = [1, 1]} : vector<2x128xf32> to vector<1x128xf32>
    %197 = vector.broadcast %196 : vector<1x128xf32> to vector<8x128xf32>
    %198 = arith.addf %195, %197 : vector<8x128xf32>
    %cst_43 = arith.constant dense<0xFF800000> : vector<8xf32>
    %199 = vector.multi_reduction <maximumf>, %198, %cst_43 [1] : vector<8x128xf32> to vector<8xf32>
    %200 = vector.shape_cast %199 : vector<8xf32> to vector<8x1xf32>
    %201 = vector.broadcast %200 : vector<8x1xf32> to vector<8x128xf32>
    %202 = arith.subf %198, %201 : vector<8x128xf32>
    %203 = math.exp %202 : vector<8x128xf32>
    %cst_44 = arith.constant dense<0.000000e+00> : vector<8xf32>
    %204 = vector.multi_reduction <add>, %203, %cst_44 [1] : vector<8x128xf32> to vector<8xf32>
    %205 = vector.shape_cast %204 : vector<8xf32> to vector<8x1xf32>
    %206 = vector.broadcast %205 : vector<8x1xf32> to vector<8x128xf32>
    %207 = arith.divf %203, %206 : vector<8x128xf32>
    %c0_45 = arith.constant 0 : index
    %c0_46 = arith.constant 0 : index
    %208 = vector.load %arg5[%c0_45, %c0_46] : memref<8x128xf32, #tpu.memory_space<vmem>>, vector<8x128xf32>
    tpu.vector_store %arg5[%c0_45, %c0_46], %207 {strides = array<i32>} : memref<8x128xf32, #tpu.memory_space<vmem>>, vector<8x128xf32>,
    return
  }
}

</mosaic_0001>

<bundles_post_ra>
// kernel: tpu_custom_call.1
= control target key start
LH: loop header
LB: loop body
LE: loop exit
PB: predicated region body
PF: predicated region fallthrough
CT: control target
= control target key end

     0   :  { %10 = vsyncpa [#allocation3], 0  ;;  %s1415_s0 = inlined_call_operand.hbm [shape: f32[8,8,128], index: 0, kind: input, shape index: {}]   ;;  %s1416_s1 = inlined_call_operand.hbm [shape: bf16[32,128], index: 1, kind: input, shape index: {}]   ;;  %s1417_s2 = inlined_call_operand.hbm [shape: bf16[32,64], index: 2, kind: input, shape index: {}]   ;;  %s1418_s3 = inlined_call_operand.hbm [shape: bf16[32,128], index: 3, kind: input, shape index: {}]   ;;  %s1419_s4 = inlined_call_operand.vmem [shape: f32[2,128], index: 4, kind: input, shape index: {}]   ;;  %s1420_s5 = inlined_call_operand.hbm [shape: f32[8,128], index: 5, kind: output, shape index: {}]  }
   0x1   :  { %11 = vsyncpa [#allocation6], 0 }
   0x2   :  { %12 = vsyncpa [#allocation9], 0 }
   0x3   :  { %13 = vsyncpa [#allocation4], 0  ;;  %s1191_s18 = smov [#allocation5]   ;;  %s1073_s22 = scalar_lea.hbm %s1416_s1, 256 }
   0x4   :  { %s31_s19 = sshll.u32 %s1191_s18, 4  ;;  %p1074_p0 = scmp.ne.s32.totalorder %s1416_s1, %s1073_s22  ;;  %s32_s19 = int_to_ptr.vmem [resolvable:$true] %s31_s19 }
   0x5   :  { %p1077_p1 = scmp.lt.u32.totalorder %s1073_s22, %s1416_s1 }
   0x7   :  { %p1079_p2 = pnand %p1077_p1, %p1074_p0 }
   0x9   :  { %1082 = shalt.err (!%p1079_p2)
}
   0xa   :  { %s1083_s27 = scalar_lea.vmem %s32_s19, 256  ;;  %p1088_p4 = scmp.lt.s32.totalorder %s32_s19, %s32_s19 }
   0xb   :  { %p1084_p3 = scmp.ne.s32.totalorder %s32_s19, %s1083_s27  ;;  %p1089_p5 = scmp.lt.s32.totalorder %s1083_s27, %s1083_s27 }
   0xd   :  { %p1090_p6 = por %p1089_p5, %p1088_p4 }
   0xf   :  { %p1091_p7 = pnand %p1090_p6, %p1084_p3 }
  0x11   :  { %1094 = shalt.err (!%p1091_p7)
}
  0x12   :  { %s1192_s28 = smov 64   ;;  %s1193_s29 = smov 4  }
  0x13   :  { %37 = dma.hbm_to_vmem [thread:$0]  %s1416_s1, 256, %s32_s19, [#allocation6], %s1192_s28, %s1192_s28, %s1193_s29  }
  0x14   :  { %s1194_s7 = smov [#allocation2]   ;;  %s1095_s11 = scalar_lea.hbm %s1415_s0, 1024 }
  0x15   :  { %s19_s8 = sshll.u32 %s1194_s7, 4  ;;  %p1096_p8 = scmp.ne.s32.totalorder %s1415_s0, %s1095_s11  ;;  %s20_s8 = int_to_ptr.vmem [resolvable:$true] %s19_s8 }
  0x16   :  { %p1099_p9 = scmp.lt.u32.totalorder %s1095_s11, %s1415_s0 }
  0x18   :  { %p1101_p10 = pnand %p1099_p9, %p1096_p8 }
  0x1a   :  { %1104 = shalt.err (!%p1101_p10)
}
  0x1b   :  { %s1105_s16 = scalar_lea.vmem %s20_s8, 1024  ;;  %p1110_p12 = scmp.lt.s32.totalorder %s20_s8, %s20_s8 }
  0x1c   :  { %p1106_p11 = scmp.ne.s32.totalorder %s20_s8, %s1105_s16  ;;  %p1111_p13 = scmp.lt.s32.totalorder %s1105_s16, %s1105_s16 }
  0x1e   :  { %p1112_p0 = por %p1111_p13, %p1110_p12 }
  0x20   :  { %p1113_p1 = pnand %p1112_p0, %p1106_p11 }
  0x22   :  { %1116 = shalt.err (!%p1113_p1)
}
  0x23   :  { %s1195_s1 = smov 128   ;;  %s1196_s17 = smov 8  }
  0x24   :  { %25 = dma.hbm_to_vmem [thread:$0]  %s1415_s0, 1024, %s20_s8, [#allocation3], %s1195_s1, %s1195_s1, %s1196_s17  }
  0x25   :  { %s1197_s20 = smov [#allocation7]   ;;  %s1198_s22 = smov [#allocation8]  }
  0x26   :  { %s43_s21 = sshll.u32 %s1197_s20, 4  ;;  %s55_s23 = sshll.u32 %s1198_s22, 4  ;;  %s44_s21 = int_to_ptr.vmem [resolvable:$true] %s43_s21  ;;  %s1262_s23 = int_to_ptr.vmem [resolvable:$true] %s55_s23 }
  0x27   :  { %s1117_s26 = scalar_lea.hbm %s1417_s2, 256 }
  0x28   :  { %p1118_p2 = scmp.ne.s32.totalorder %s1417_s2, %s1117_s26  ;;  %p1121_p3 = scmp.lt.u32.totalorder %s1117_s26, %s1417_s2 }
  0x2a   :  { %p1123_p4 = pnand %p1121_p3, %p1118_p2 }
  0x2c   :  { %1126 = shalt.err (!%p1123_p4)
}
  0x2d   :  { %s1127_s0 = scalar_lea.vmem %s44_s21, 256  ;;  %p1132_p6 = scmp.lt.s32.totalorder %s44_s21, %s44_s21 }
  0x2e   :  { %p1128_p5 = scmp.ne.s32.totalorder %s44_s21, %s1127_s0  ;;  %p1133_p7 = scmp.lt.s32.totalorder %s1127_s0, %s1127_s0 }
  0x30   :  { %p1134_p8 = por %p1133_p7, %p1132_p6 }
  0x32   :  { %p1135_p9 = pnand %p1134_p8, %p1128_p5 }
  0x34   :  { %1138 = shalt.err (!%p1135_p9)
}
  0x35   :  { %49 = dma.hbm_to_vmem [thread:$0]  %s1417_s2, 256, %s44_s21, [#allocation6], %s1192_s28, %s1192_s28, %s1193_s29  }
  0x36   :  { %s1139_s12 = scalar_lea.hbm %s1418_s3, 256 }
  0x37   :  { %p1140_p10 = scmp.ne.s32.totalorder %s1418_s3, %s1139_s12  ;;  %p1143_p11 = scmp.lt.u32.totalorder %s1139_s12, %s1418_s3 }
  0x39   :  { %p1145_p12 = pnand %p1143_p11, %p1140_p10 }
  0x3b   :  { %1148 = shalt.err (!%p1145_p12)
}
  0x3c   :  { %s1149_s1 = scalar_lea.vmem %s1262_s23, 256  ;;  %p1154_p0 = scmp.lt.s32.totalorder %s1262_s23, %s1262_s23 }
  0x3d   :  { %p1150_p13 = scmp.ne.s32.totalorder %s1262_s23, %s1149_s1  ;;  %p1155_p1 = scmp.lt.s32.totalorder %s1149_s1, %s1149_s1 }
  0x3f   :  { %p1156_p2 = por %p1155_p1, %p1154_p0 }
  0x41   :  { %p1157_p3 = pnand %p1156_p2, %p1150_p13 }
  0x43   :  { %1160 = shalt.err (!%p1157_p3)
}
  0x44   :  { %61 = dma.hbm_to_vmem [thread:$0]  %s1418_s3, 256, %s1262_s23, [#allocation9], %s1192_s28, %s1192_s28, %s1193_s29  }
  0x45   :  { %1183 = dma.done.wait [#allocation3], 1024  }
  0x46   :  { %1184 = vsyncadd [#allocation3], 4294966272 }
  0x47   :  { %1185 = dma.done.wait [#allocation6], 512  }
  0x48   :  { %1186 = vsyncadd [#allocation6], 4294966784 }
  0x49   :  { %1187 = dma.done.wait [#allocation9], 256  }
  0x4a   :  { %1188 = vsyncadd [#allocation9], 4294967040  ;;  %v1199_v0 = vmov 0.0   ;;  %vm1200_vm0 = vmmov 0   ;;  %v1305_v1 = vld [vmem:[#allocation5] sm:$0xff]   ;;  %v1308_v2 = vld [vmem:[#allocation5 + $0x8] sm:$0xff]  }
  0x4b   :  { %905 = vmatprep.subr.bf16.mxu0 %v1199_v0  ;;  %909 = vmatprep.mubr.msk.bf16.mxu0 %vm1200_vm0, %v1199_v0  ;;  %v1201_v3 = vmov 0   ;;  %v81_v4 = vld [vmem:[#allocation2] sm:$0xff]  ;;  %s1202_s3 = smov 32   ;;  %vm94_vm1 = vcmask 261120   ;;  %v164_v25 = vld [vmem:[#allocation2 + $0x8] sm:$0xff]  ;;  %v238_v46 = vld [vmem:[#allocation2 + $0x10] sm:$0xff] }
  0x4c   :  { %913 = vmatprep.subr.bf16.mxu1 %v1199_v0  ;;  %917 = vmatprep.mubr.msk.bf16.mxu1 %vm1200_vm0, %v1199_v0  ;;  %s1203_s29 = smov 96  }
  0x4d   :  { %906 = vmatpush3.bf16.msra.mxu0 %v1305_v1  ;;  %914 = vmatpush3.bf16.msra.mxu1 %v1305_v1 }
  0x4e   :  { %907 = vmatprep.subr.bf16.mxu0 %v1199_v0  ;;  %915 = vmatprep.subr.bf16.mxu1 %v1199_v0 }
  0x51   :  { %908 = vmatpush3.bf16.msra.mxu0 %v1308_v2  ;;  %916 = vmatpush3.bf16.msra.mxu1 %v1308_v2 }
  0x52   :  { %921 = vmatprep.subr.bf16.mxu0 %v1199_v0  ;;  %929 = vmatprep.subr.bf16.mxu1 %v1199_v0 }
  0x54   :  { %910 = vmatmul.mubr.bf16.vlgmr.msra.gmra.mrb[0].mxu0 %v1201_v3 }
  0x55   :  { %922 = vmatpush3.bf16.msra.mxu0 %v1305_v1  ;;  %925 = vmatprep.mubr.msk.bf16.mxu0 %vm1200_vm0, %v1199_v0 }
  0x56   :  { %923 = vmatprep.subr.bf16.mxu0 %v1199_v0 }
  0x59   :  { %924 = vmatpush3.bf16.msra.mxu0 %v1308_v2 }
  0x5a   :  { %937 = vmatprep.subr.bf16.mxu0 %v1199_v0 }
 0x127   :  { %v132_v5 = vpop.f32.mrb[0].mxu0 }
 0x128   :  { %v138_v6 = vadd.f32 %v132_v5, %v81_v4  ;;  %v911_v7 = vpop.f32.mrb[1].mxu0 }
 0x129   :  { %v135_v8 = vpop.f32.mrb[2].mxu0 }
 0x12a   :  { %1005 = vtanh.f32 %v138_v6  ;;  %v912_v9 = vpop.f32.mrb[3].mxu0  ;;  %v854_v11 = vmul.f32 -1.442695, %v138_v6  ;;  %v312_v6 = vld [vmem:[#allocation2 + $0x18] sm:$0xff] }
 0x12c   :  { %1007 = vpow2.f32 %v854_v11 }
 0x134   :  { %v1006_v10 = vpop.eup %1005 }
 0x135   :  { %148 = vrot.lane.b32.xlu0 %v1006_v10, %s1202_s3 }
 0x136   :  { %v1008_v12 = vpop.eup %1007 }
 0x137   :  { %v142_v13 = vadd.f32 1.0, %v1008_v12 }
 0x139   :  { %1009 = vrcp.f32 %v142_v13 }
 0x143   :  { %v1010_v14 = vpop.eup %1009 }
 0x144   :  { %v146_v17 = vmul.f32 0.0, %v1010_v14 }
 0x1a7   :  { %v149_v15 = vpop.permute.xlu0 %148 }
 0x1a8   :  { %v151_v16 = vmul.f32 %v1010_v14, %v149_v15 }
 0x1aa   :  { %153 = vrot.lane.b32.xlu0 %v151_v16, %s1202_s3 }
 0x21c   :  { %v154_v18 = vpop.permute.xlu0 %153 }
 0x21d   :  { %v156_v19 = vadd.f32 %v154_v18, %v146_v17 }
 0x21f   :  { %1011 = vtanh.f32 %v156_v19 }
 0x229   :  { %v1012_v20 = vpop.eup %1011 }
 0x22a   :  { %159 = vrot.lane.b32.xlu1 %v1012_v20, %s1202_s3 }
 0x29c   :  { %v160_v21 = vpop.permute.xlu1 %159 }
 0x29d   :  { %v162_v22 = vmul.f32 %v1010_v14, %v160_v21 }
 0x29f   :  { %v165_v23 = vpack.c.bf16 %v162_v22, %v162_v22 }
 0x2a1   :  { %167 = vrot.lane.b32.xlu1 %v165_v23, %s1192_s28 }
 0x313   :  { %v168_v24 = vpop.permute.xlu1 %167 }
 0x314   :  { %918 = vmatmul.mubr.msk.bf16.vlgmr.msra.gmra.mrb[0].mxu1 %vm94_vm1, %v168_v24 }
 0x315   :  { %930 = vmatpush3.bf16.msra.mxu1 %v1305_v1  ;;  %933 = vmatprep.mubr.msk.bf16.mxu1 %vm1200_vm0, %v1199_v0 }
 0x316   :  { %931 = vmatprep.subr.bf16.mxu1 %v1199_v0 }
 0x319   :  { %932 = vmatpush3.bf16.msra.mxu1 %v1308_v2 }
 0x31a   :  { %945 = vmatprep.subr.bf16.mxu1 %v1199_v0 }
 0x3e7   :  { %v206_v26 = vpop.f32.mrb[0].mxu1 }
 0x3e8   :  { %v212_v27 = vadd.f32 %v206_v26, %v164_v25  ;;  %v919_v28 = vpop.f32.mrb[1].mxu1 }
 0x3e9   :  { %v209_v29 = vpop.f32.mrb[2].mxu1 }
 0x3ea   :  { %1013 = vtanh.f32 %v212_v27  ;;  %v920_v30 = vpop.f32.mrb[3].mxu1  ;;  %v856_v32 = vmul.f32 -1.442695, %v212_v27  ;;  %v386_v27 = vld [vmem:[#allocation2 + $0x20] sm:$0xff] }
 0x3ec   :  { %1015 = vpow2.f32 %v856_v32 }
 0x3f4   :  { %v1014_v31 = vpop.eup %1013 }
 0x3f5   :  { %222 = vrot.lane.b32.xlu0 %v1014_v31, %s1202_s3 }
 0x3f6   :  { %v1016_v33 = vpop.eup %1015 }
 0x3f7   :  { %v216_v34 = vadd.f32 1.0, %v1016_v33 }
 0x3f9   :  { %1017 = vrcp.f32 %v216_v34 }
 0x403   :  { %v1018_v35 = vpop.eup %1017 }
 0x404   :  { %v220_v38 = vmul.f32 %v1018_v35, %v156_v19 }
 0x467   :  { %v223_v36 = vpop.permute.xlu0 %222 }
 0x468   :  { %v225_v37 = vmul.f32 %v1018_v35, %v223_v36 }
 0x46a   :  { %227 = vrot.lane.b32.xlu1 %v225_v37, %s1202_s3 }
 0x4dc   :  { %v228_v39 = vpop.permute.xlu1 %227 }
 0x4dd   :  { %v230_v40 = vadd.f32 %v228_v39, %v220_v38 }
 0x4df   :  { %1019 = vtanh.f32 %v230_v40 }
 0x4e9   :  { %v1020_v41 = vpop.eup %1019 }
 0x4ea   :  { %233 = vrot.lane.b32.xlu0 %v1020_v41, %s1202_s3 }
 0x55c   :  { %v234_v42 = vpop.permute.xlu0 %233 }
 0x55d   :  { %v236_v43 = vmul.f32 %v1018_v35, %v234_v42 }
 0x55f   :  { %v239_v44 = vpack.c.bf16 %v236_v43, %v236_v43 }
 0x561   :  { %241 = vrot.lane.b32.xlu1 %v239_v44, %s1192_s28 }
 0x5d3   :  { %v242_v45 = vpop.permute.xlu1 %241 }
 0x5d4   :  { %926 = vmatmul.mubr.msk.bf16.vlgmr.msra.gmra.mrb[4].mxu0 %vm94_vm1, %v242_v45 }
 0x5d5   :  { %938 = vmatpush3.bf16.msra.mxu0 %v1305_v1  ;;  %941 = vmatprep.mubr.msk.bf16.mxu0 %vm1200_vm0, %v1199_v0 }
 0x5d6   :  { %939 = vmatprep.subr.bf16.mxu0 %v1199_v0 }
 0x5d9   :  { %940 = vmatpush3.bf16.msra.mxu0 %v1308_v2 }
 0x5da   :  { %953 = vmatprep.subr.bf16.mxu0 %v1199_v0 }
 0x6a7   :  { %v280_v47 = vpop.f32.mrb[4].mxu0 }
 0x6a8   :  { %v286_v48 = vadd.f32 %v280_v47, %v238_v46  ;;  %v927_v49 = vpop.f32.mrb[5].mxu0 }
 0x6a9   :  { %v283_v50 = vpop.f32.mrb[6].mxu0 }
 0x6aa   :  { %1021 = vtanh.f32 %v286_v48  ;;  %v928_v51 = vpop.f32.mrb[7].mxu0  ;;  %v858_v53 = vmul.f32 -1.442695, %v286_v48  ;;  %v460_v48 = vld [vmem:[#allocation2 + $0x28] sm:$0xff] }
 0x6ac   :  { %1023 = vpow2.f32 %v858_v53 }
 0x6b4   :  { %v1022_v52 = vpop.eup %1021 }
 0x6b5   :  { %296 = vrot.lane.b32.xlu0 %v1022_v52, %s1202_s3 }
 0x6b6   :  { %v1024_v54 = vpop.eup %1023 }
 0x6b7   :  { %v290_v55 = vadd.f32 1.0, %v1024_v54 }
 0x6b9   :  { %1025 = vrcp.f32 %v290_v55 }
 0x6c3   :  { %v1026_v56 = vpop.eup %1025 }
 0x6c4   :  { %v294_v59 = vmul.f32 %v1026_v56, %v230_v40 }
 0x727   :  { %v297_v57 = vpop.permute.xlu0 %296 }
 0x728   :  { %v299_v58 = vmul.f32 %v1026_v56, %v297_v57 }
 0x72a   :  { %301 = vrot.lane.b32.xlu1 %v299_v58, %s1202_s3 }
 0x79c   :  { %v302_v60 = vpop.permute.xlu1 %301 }
 0x79d   :  { %v304_v61 = vadd.f32 %v302_v60, %v294_v59 }
 0x79f   :  { %1027 = vtanh.f32 %v304_v61 }
 0x7a9   :  { %v1028_v62 = vpop.eup %1027 }
 0x7aa   :  { %307 = vrot.lane.b32.xlu0 %v1028_v62, %s1202_s3 }
 0x81c   :  { %v308_v63 = vpop.permute.xlu0 %307 }
 0x81d   :  { %v310_v3 = vmul.f32 %v1026_v56, %v308_v63 }
 0x81f   :  { %v313_v4 = vpack.c.bf16 %v310_v3, %v310_v3 }
 0x821   :  { %315 = vrot.lane.b32.xlu1 %v313_v4, %s1192_s28 }
 0x893   :  { %v316_v5 = vpop.permute.xlu1 %315 }
 0x894   :  { %934 = vmatmul.mubr.msk.bf16.vlgmr.msra.gmra.mrb[4].mxu1 %vm94_vm1, %v316_v5 }
 0x895   :  { %946 = vmatpush3.bf16.msra.mxu1 %v1305_v1  ;;  %949 = vmatprep.mubr.msk.bf16.mxu1 %vm1200_vm0, %v1199_v0 }
 0x896   :  { %947 = vmatprep.subr.bf16.mxu1 %v1199_v0 }
 0x899   :  { %948 = vmatpush3.bf16.msra.mxu1 %v1308_v2 }
 0x89a   :  { %961 = vmatprep.subr.bf16.mxu1 %v1199_v0 }
 0x967   :  { %v354_v7 = vpop.f32.mrb[4].mxu1 }
 0x968   :  { %v360_v8 = vadd.f32 %v354_v7, %v312_v6  ;;  %v935_v9 = vpop.f32.mrb[5].mxu1  ;;  %v534_v6 = vld [vmem:[#allocation2 + $0x30] sm:$0xff] }
 0x969   :  { %v357_v10 = vpop.f32.mrb[6].mxu1 }
 0x96a   :  { %1029 = vtanh.f32 %v360_v8  ;;  %v936_v11 = vpop.f32.mrb[7].mxu1  ;;  %v860_v13 = vmul.f32 -1.442695, %v360_v8 }
 0x96c   :  { %1031 = vpow2.f32 %v860_v13 }
 0x974   :  { %v1030_v12 = vpop.eup %1029 }
 0x975   :  { %370 = vrot.lane.b32.xlu0 %v1030_v12, %s1202_s3 }
 0x976   :  { %v1032_v14 = vpop.eup %1031 }
 0x977   :  { %v364_v15 = vadd.f32 1.0, %v1032_v14 }
 0x979   :  { %1033 = vrcp.f32 %v364_v15 }
 0x983   :  { %v1034_v16 = vpop.eup %1033 }
 0x984   :  { %v368_v19 = vmul.f32 %v1034_v16, %v304_v61 }
 0x9e7   :  { %v371_v17 = vpop.permute.xlu0 %370 }
 0x9e8   :  { %v373_v18 = vmul.f32 %v1034_v16, %v371_v17 }
 0x9ea   :  { %375 = vrot.lane.b32.xlu1 %v373_v18, %s1202_s3 }
 0xa5c   :  { %v376_v20 = vpop.permute.xlu1 %375 }
 0xa5d   :  { %v378_v21 = vadd.f32 %v376_v20, %v368_v19 }
 0xa5f   :  { %1035 = vtanh.f32 %v378_v21 }
 0xa69   :  { %v1036_v22 = vpop.eup %1035 }
 0xa6a   :  { %381 = vrot.lane.b32.xlu0 %v1036_v22, %s1202_s3 }
 0xadc   :  { %v382_v23 = vpop.permute.xlu0 %381 }
 0xadd   :  { %v384_v24 = vmul.f32 %v1034_v16, %v382_v23 }
 0xadf   :  { %v387_v25 = vpack.c.bf16 %v384_v24, %v384_v24 }
 0xae1   :  { %389 = vrot.lane.b32.xlu1 %v387_v25, %s1192_s28 }
 0xb53   :  { %v390_v26 = vpop.permute.xlu1 %389 }
 0xb54   :  { %942 = vmatmul.mubr.msk.bf16.vlgmr.msra.gmra.mrb[8].mxu0 %vm94_vm1, %v390_v26 }
 0xb55   :  { %954 = vmatpush3.bf16.msra.mxu0 %v1305_v1  ;;  %957 = vmatprep.mubr.msk.bf16.mxu0 %vm1200_vm0, %v1199_v0 }
 0xb56   :  { %955 = vmatprep.subr.bf16.mxu0 %v1199_v0 }
 0xb59   :  { %956 = vmatpush3.bf16.msra.mxu0 %v1308_v2 }
 0xb5a   :  { %969 = vmatprep.subr.bf16.mxu0 %v1199_v0 }
 0xc27   :  { %v428_v28 = vpop.f32.mrb[8].mxu0 }
 0xc28   :  { %v434_v29 = vadd.f32 %v428_v28, %v386_v27  ;;  %v943_v30 = vpop.f32.mrb[9].mxu0  ;;  %v608_v27 = vld [vmem:[#allocation2 + $0x38] sm:$0xff] }
 0xc29   :  { %v431_v31 = vpop.f32.mrb[10].mxu0 }
 0xc2a   :  { %1037 = vtanh.f32 %v434_v29  ;;  %v944_v32 = vpop.f32.mrb[11].mxu0  ;;  %v862_v34 = vmul.f32 -1.442695, %v434_v29 }
 0xc2c   :  { %1039 = vpow2.f32 %v862_v34 }
 0xc34   :  { %v1038_v33 = vpop.eup %1037 }
 0xc35   :  { %444 = vrot.lane.b32.xlu0 %v1038_v33, %s1202_s3 }
 0xc36   :  { %v1040_v35 = vpop.eup %1039 }
 0xc37   :  { %v438_v36 = vadd.f32 1.0, %v1040_v35 }
 0xc39   :  { %1041 = vrcp.f32 %v438_v36 }
 0xc43   :  { %v1042_v37 = vpop.eup %1041 }
 0xc44   :  { %v442_v40 = vmul.f32 %v1042_v37, %v378_v21 }
 0xca7   :  { %v445_v38 = vpop.permute.xlu0 %444 }
 0xca8   :  { %v447_v39 = vmul.f32 %v1042_v37, %v445_v38 }
 0xcaa   :  { %449 = vrot.lane.b32.xlu1 %v447_v39, %s1202_s3 }
 0xd1c   :  { %v450_v41 = vpop.permute.xlu1 %449 }
 0xd1d   :  { %v452_v42 = vadd.f32 %v450_v41, %v442_v40 }
 0xd1f   :  { %1043 = vtanh.f32 %v452_v42 }
 0xd29   :  { %v1044_v43 = vpop.eup %1043 }
 0xd2a   :  { %455 = vrot.lane.b32.xlu0 %v1044_v43, %s1202_s3  ;;  %v1001_v43 = vld [vmem:[#allocation7] sm:$0xff]  }
 0xd9c   :  { %v456_v44 = vpop.permute.xlu0 %455 }
 0xd9d   :  { %v458_v45 = vmul.f32 %v1042_v37, %v456_v44  ;;  %v1002_v44 = vld [vmem:[#allocation7 + $0x8] sm:$0xff]  }
 0xd9f   :  { %v461_v46 = vpack.c.bf16 %v458_v45, %v458_v45 }
 0xda1   :  { %463 = vrot.lane.b32.xlu1 %v461_v46, %s1192_s28 }
 0xe13   :  { %v464_v47 = vpop.permute.xlu1 %463 }
 0xe14   :  { %950 = vmatmul.mubr.msk.bf16.vlgmr.msra.gmra.mrb[8].mxu1 %vm94_vm1, %v464_v47 }
 0xe15   :  { %962 = vmatpush3.bf16.msra.mxu1 %v1305_v1  ;;  %965 = vmatprep.mubr.msk.bf16.mxu1 %vm1200_vm0, %v1199_v0 }
 0xe16   :  { %963 = vmatprep.subr.bf16.mxu1 %v1199_v0 }
 0xe19   :  { %964 = vmatpush3.bf16.msra.mxu1 %v1308_v2 }
 0xe1a   :  { %977 = vmatprep.subr.bf16.mxu1 %v1199_v0 }
 0xee7   :  { %v502_v49 = vpop.f32.mrb[8].mxu1 }
 0xee8   :  { %v508_v50 = vadd.f32 %v502_v49, %v460_v48  ;;  %v951_v51 = vpop.f32.mrb[9].mxu1 }
 0xee9   :  { %v505_v52 = vpop.f32.mrb[10].mxu1  ;;  %v1004_v51 = vld [vmem:[#allocation8 + $0x8] sm:$0xff]  }
 0xeea   :  { %1045 = vtanh.f32 %v508_v50  ;;  %v952_v53 = vpop.f32.mrb[11].mxu1  ;;  %v864_v1 = vmul.f32 -1.442695, %v508_v50  ;;  %v1003_v50 = vld [vmem:[#allocation8] sm:$0xff]  }
 0xeec   :  { %1047 = vpow2.f32 %v864_v1 }
 0xef4   :  { %v1046_v54 = vpop.eup %1045 }
 0xef5   :  { %518 = vrot.lane.b32.xlu0 %v1046_v54, %s1202_s3 }
 0xef6   :  { %v1048_v55 = vpop.eup %1047 }
 0xef7   :  { %v512_v56 = vadd.f32 1.0, %v1048_v55 }
 0xef9   :  { %1049 = vrcp.f32 %v512_v56  ;;  %v755_v56 = vlaneseq }
 0xf03   :  { %v1050_v57 = vpop.eup %1049 }
 0xf04   :  { %v516_v59 = vmul.f32 %v1050_v57, %v452_v42 }
 0xf67   :  { %v519_v58 = vpop.permute.xlu0 %518 }
 0xf68   :  { %v521_v2 = vmul.f32 %v1050_v57, %v519_v58 }
 0xf6a   :  { %523 = vrot.lane.b32.xlu1 %v521_v2, %s1202_s3  ;;  %v749_v2 = vld [vmem:[%s1419_s4] sm:$0x3]  ;;  %s1204_s4 = smov [#allocation10]  }
 0xf6b   :  { %s841_s19 = sshll.u32 %s1204_s4, 4  ;;  %s842_s19 = int_to_ptr.vmem [resolvable:$true] %s841_s19 }
 0xf6c   :  { %s1161_s20 = scalar_lea.vmem %s842_s19, 128  ;;  %p1166_p5 = scmp.lt.s32.totalorder %s842_s19, %s842_s19 }
 0xf6d   :  { %p1162_p4 = scmp.ne.s32.totalorder %s842_s19, %s1161_s20  ;;  %p1167_p6 = scmp.lt.s32.totalorder %s1161_s20, %s1161_s20 }
 0xf6f   :  { %p1168_p7 = por %p1167_p6, %p1166_p5 }
 0xf71   :  { %p1169_p8 = pnand %p1168_p7, %p1162_p4 }
 0xfdc   :  { %v524_v60 = vpop.permute.xlu1 %523 }
 0xfdd   :  { %v526_v61 = vadd.f32 %v524_v60, %v516_v59 }
 0xfdf   :  { %1051 = vtanh.f32 %v526_v61 }
 0xfe9   :  { %v1052_v62 = vpop.eup %1051 }
 0xfea   :  { %529 = vrot.lane.b32.xlu0 %v1052_v62, %s1202_s3 }
0x105c   :  { %v530_v63 = vpop.permute.xlu0 %529 }
0x105d   :  { %v532_v3 = vmul.f32 %v1050_v57, %v530_v63  ;;  %v756_v57 = vshrl.u32 %v755_v56, 7 }
0x105f   :  { %v535_v4 = vpack.c.bf16 %v532_v3, %v532_v3  ;;  %v757_v58 = vsub.s32 0, %v756_v57  ;;  %v768_v3 = vsub.s32 1, %v756_v57 }
0x1061   :  { %537 = vrot.lane.b32.xlu1 %v535_v4, %s1192_s28  ;;  %v758_v59 = vrot.slane %v749_v2, %v757_v58  ;;  %v769_v4 = vrot.slane %v749_v2, %v768_v3 }
0x10d3   :  { %v538_v5 = vpop.permute.xlu1 %537 }
0x10d4   :  { %958 = vmatmul.mubr.msk.bf16.vlgmr.msra.gmra.mrb[12].mxu0 %vm94_vm1, %v538_v5 }
0x10d5   :  { %973 = vmatprep.mubr.msk.bf16.mxu0 %vm1200_vm0, %v1199_v0  ;;  %970 = vmatpush3.bf16.msra.mxu0 %v1001_v43 }
0x10d6   :  { %971 = vmatprep.subr.bf16.mxu0 %v1199_v0 }
0x10d9   :  { %972 = vmatpush3.bf16.msra.mxu0 %v1002_v44 }
0x11a7   :  { %v576_v7 = vpop.f32.mrb[12].mxu0 }
0x11a8   :  { %v582_v8 = vadd.f32 %v576_v7, %v534_v6  ;;  %v959_v9 = vpop.f32.mrb[13].mxu0 }
0x11a9   :  { %v579_v10 = vpop.f32.mrb[14].mxu0 }
0x11aa   :  { %1053 = vtanh.f32 %v582_v8  ;;  %v960_v11 = vpop.f32.mrb[15].mxu0  ;;  %v866_v13 = vmul.f32 -1.442695, %v582_v8 }
0x11ac   :  { %1055 = vpow2.f32 %v866_v13 }
0x11b4   :  { %v1054_v12 = vpop.eup %1053 }
0x11b5   :  { %592 = vrot.lane.b32.xlu0 %v1054_v12, %s1202_s3 }
0x11b6   :  { %v1056_v14 = vpop.eup %1055 }
0x11b7   :  { %v586_v15 = vadd.f32 1.0, %v1056_v14 }
0x11b9   :  { %1057 = vrcp.f32 %v586_v15 }
0x11c3   :  { %v1058_v16 = vpop.eup %1057 }
0x11c4   :  { %v590_v19 = vmul.f32 %v1058_v16, %v526_v61 }
0x1227   :  { %v593_v17 = vpop.permute.xlu0 %592 }
0x1228   :  { %v595_v18 = vmul.f32 %v1058_v16, %v593_v17 }
0x122a   :  { %597 = vrot.lane.b32.xlu1 %v595_v18, %s1202_s3 }
0x129c   :  { %v598_v20 = vpop.permute.xlu1 %597 }
0x129d   :  { %v600_v21 = vadd.f32 %v598_v20, %v590_v19 }
0x129f   :  { %1059 = vtanh.f32 %v600_v21 }
0x12a9   :  { %v1060_v22 = vpop.eup %1059 }
0x12aa   :  { %603 = vrot.lane.b32.xlu0 %v1060_v22, %s1202_s3 }
0x131c   :  { %v604_v23 = vpop.permute.xlu0 %603 }
0x131d   :  { %v606_v24 = vmul.f32 %v1058_v16, %v604_v23 }
0x131f   :  { %v609_v25 = vpack.c.bf16 %v606_v24, %v606_v24 }
0x1321   :  { %611 = vrot.lane.b32.xlu1 %v609_v25, %s1192_s28 }
0x1393   :  { %v612_v26 = vpop.permute.xlu1 %611 }
0x1394   :  { %966 = vmatmul.mubr.msk.bf16.vlgmr.msra.gmra.mrb[12].mxu1 %vm94_vm1, %v612_v26 }
0x1395   :  { %981 = vmatprep.mubr.msk.bf16.mxu1 %vm1200_vm0, %v1199_v0  ;;  %978 = vmatpush3.bf16.msra.mxu1 %v1003_v50 }
0x1396   :  { %979 = vmatprep.subr.bf16.mxu1 %v1199_v0 }
0x1399   :  { %980 = vmatpush3.bf16.msra.mxu1 %v1004_v51 }
0x1467   :  { %v650_v28 = vpop.f32.mrb[12].mxu1 }
0x1468   :  { %v656_v29 = vadd.f32 %v650_v28, %v608_v27  ;;  %v967_v30 = vpop.f32.mrb[13].mxu1 }
0x1469   :  { %v653_v31 = vpop.f32.mrb[14].mxu1 }
0x146a   :  { %1061 = vtanh.f32 %v656_v29  ;;  %v968_v32 = vpop.f32.mrb[15].mxu1  ;;  %v868_v34 = vmul.f32 -1.442695, %v656_v29 }
0x146c   :  { %1063 = vpow2.f32 %v868_v34 }
0x1474   :  { %v1062_v33 = vpop.eup %1061 }
0x1475   :  { %666 = vrot.lane.b32.xlu0 %v1062_v33, %s1202_s3 }
0x1476   :  { %v1064_v35 = vpop.eup %1063 }
0x1477   :  { %v660_v36 = vadd.f32 1.0, %v1064_v35 }
0x1479   :  { %1065 = vrcp.f32 %v660_v36 }
0x1483   :  { %v1066_v37 = vpop.eup %1065 }
0x1484   :  { %v664_v40 = vmul.f32 %v1066_v37, %v600_v21 }
0x14e7   :  { %v667_v38 = vpop.permute.xlu0 %666 }
0x14e8   :  { %v669_v39 = vmul.f32 %v1066_v37, %v667_v38 }
0x14ea   :  { %671 = vrot.lane.b32.xlu1 %v669_v39, %s1202_s3 }
0x155c   :  { %v672_v41 = vpop.permute.xlu1 %671 }
0x155d   :  { %v674_v42 = vadd.f32 %v672_v41, %v664_v40 }
0x155f   :  { %1067 = vtanh.f32 %v674_v42 }
0x1569   :  { %v1068_v45 = vpop.eup %1067 }
0x156a   :  { %677 = vrot.lane.b32.xlu0 %v1068_v45, %s1202_s3 }
0x15dc   :  { %v678_v46 = vpop.permute.xlu0 %677 }
0x15dd   :  { %v680_v47 = vmul.f32 %v1066_v37, %v678_v46 }
0x15df   :  { %v681_v48 = vpack.c.bf16 %v680_v47, %v680_v47 }
0x15e1   :  { %687 = vrot.lane.b32.xlu1 %v681_v48, %s1192_s28 }
0x1653   :  { %v688_v49 = vpop.permute.xlu1 %687 }
0x1654   :  { %974 = vmatmul.mubr.msk.bf16.vlgmr.msra.gmra.mrb[16].mxu0 %vm94_vm1, %v688_v49 }
0x1727   :  { %v738_v52 = vpop.f32.mrb[16].mxu0 }
0x1728   :  { %v745_v53 = vrot.slane %v738_v52, 4  ;;  %v975_v54 = vpop.f32.mrb[17].mxu0 }
0x1729   :  { %v741_v1 = vpop.f32.mrb[18].mxu0 }
0x172a   :  { %751 = vrot.lane.b32.xlu0 %v745_v53, %s1203_s29  ;;  %v976_v55 = vpop.f32.mrb[19].mxu0 }
0x179c   :  { %v752_v60 = vpop.permute.xlu0 %751 }
0x179d   :  { %v754_v61 = vadd.f32 %v752_v60, %v738_v52 }
0x179f   :  { %v759_v0 = vadd.f32 %v758_v59, %v754_v61 }
0x17a1   :  { %v760_v62 = vmax.f32 %v759_v0, 0.0 }
0x17a3   :  { %v761_v63 = vpack.c.bf16 %v760_v62, %v760_v62 }
0x17a5   :  { %982 = vmatmul.mubr.msk.bf16.vlgmr.msra.gmra.mrb[16].mxu1 %vm94_vm1, %v761_v63 }
0x1878   :  { %v819_v5 = vpop.f32.mrb[16].mxu1 }
0x1879   :  { %v820_v6 = vadd.f32 %v819_v5, %v769_v4  ;;  %v983_v7 = vpop.f32.mrb[17].mxu1 }
0x187a   :  { %v822_v8 = vpop.f32.mrb[18].mxu1 }
0x187b   :  { %825 = vmax.xlane.f32.xlu1 %v820_v6  ;;  %v984_v9 = vpop.f32.mrb[19].mxu1 }
0x1908   :  { %v826_v10 = vpop.xlane.xlu1 %825 }
0x1909   :  { %v827_v11 = vsub.f32 %v820_v6, %v826_v10 }
0x190b   :  { %v828_v12 = vmul.f32 1.442695, %v827_v11 }
0x190d   :  { %1069 = vpow2.f32 %v828_v12 }
0x1917   :  { %v1070_v13 = vpop.eup %1069 }
0x1918   :  { %830 = vadd.xlane.f32.xlu0 %v1070_v13 }
0x19a5   :  { %v831_v14 = vpop.xlane.xlu0 %830 }
0x19a6   :  { %1071 = vrcp.f32 %v831_v14 }
0x19b0   :  { %v1072_v15 = vpop.eup %1071 }
0x19b1   :  { %v833_v16 = vmul.f32 %v1072_v15, %v1070_v13 }
0x19b3   :  { %834 = vst [vmem:[#allocation10] sm:$0xff] %v833_v16 }
0x19b4   :  { %1172 = shalt.err (!%p1169_p8)
}
0x19b5   :  { %s1173_s23 = scalar_lea.hbm %s1420_s5, 128 }
0x19b6   :  { %p1174_p9 = scmp.ne.s32.totalorder %s1420_s5, %s1173_s23  ;;  %p1177_p10 = scmp.lt.u32.totalorder %s1173_s23, %s1420_s5 }
0x19b8   :  { %p1179_p11 = pnand %p1177_p10, %p1174_p9 }
0x19ba   :  { %1182 = shalt.err (!%p1179_p11)
}
0x19bb   :  { %844 = dma.vmem_to_hbm [thread:$0]  %s842_s19, 128, %s1420_s5, [#allocation4]  }
0x19bc   :  { %1189 = dma.done.wait [#allocation4], 128  }
0x19bd   :  { %1190 = vsyncadd [#allocation4], 4294967168 }
0x19be   :  { %848 = vsyncpa [#allocation3], 1 }
0x19bf   :  { %849 = vsyncpa [#allocation6], 1 }
0x19c0   :  { %850 = vsyncpa [#allocation9], 1 }
0x19c1   :  { %851 = vsyncpa [#allocation4], 1 }

</bundles_post_ra>
